<compile_context>
chip_gen: v5e
topology: v5e:2x2
jax: 0.10.0
libtpu: 0.0.40
codegen_flags: <defaults>
</compile_context>

<pallas_src>
import jax
import jax.numpy as jnp
from jax.experimental import pallas as pl
from jax.experimental.pallas import tpu as pltpu


def _make_mlp_kernel(activation: str):
    if activation == "relu":
        act = lambda v: jnp.maximum(v, 0.0)
    elif activation == "tanh":
        act = jnp.tanh
    else:
        raise ValueError(f"unsupported activation: {activation}")

    def kernel(xT_ref, w1T_ref, b1_ref, w2T_ref, b2_ref, w3T_ref, b3_ref, oT_ref):
        # Transposed layout: batch on lanes (last dim) -> dense 128-lane vregs and a
        # lane-dense (1, TILE_B) output store.
        xT = xT_ref[...]                                              # (n_in, TILE_B) bf16
        # layer 1: h1^T = W1^T @ x^T + b1   (bf16 MXU inputs, f32 accumulate)
        h1 = jnp.dot(w1T_ref[...], xT,
                     preferred_element_type=jnp.float32) + b1_ref[...]
        h1 = act(h1)                                                  # f32 epilogue
        # layer 2
        h2 = jnp.dot(w2T_ref[...], h1.astype(jnp.bfloat16),
                     preferred_element_type=jnp.float32) + b2_ref[...]
        h2 = act(h2)
        # layer 3 + sigmoid
        logits = jnp.dot(w3T_ref[...], h2.astype(jnp.bfloat16),
                         preferred_element_type=jnp.float32) + b3_ref[...]
        oT_ref[...] = jax.nn.sigmoid(logits)                          # (1, TILE_B) f32

    return kernel


def bnn_forward(x, eff_params, *, activation="relu", tile_b=512):
    """Forward pass of one posterior sample of the BNN.

    x: (B, n_inputs) f32.
    eff_params: list of (W (in,out) f32, b (1,out) f32) for the 3 (Bayes)Linear layers,
                already sampled from the posterior (mu + exp(log_sigma) * eps).
    """
    (w1, b1), (w2, b2), (w3, b3) = eff_params
    B, n_in = x.shape

    # Lane-aligned batch tile (multiple of 128), capped at tile_b; pad batch up.
    tile_b = min(tile_b, max(128, pl.cdiv(B, 128) * 128))
    b_pad = pl.cdiv(B, tile_b) * tile_b
    grid = (b_pad // tile_b,)

    # Batch on lanes: feed x^T as (n_in, B_pad); bf16 halves the dominant HBM stream.
    xT = jnp.zeros((n_in, b_pad), jnp.bfloat16).at[:, :B].set(x.T.astype(jnp.bfloat16))
    # Pre-transpose weights to (out, in) bf16; biases as (out, 1) f32 columns.
    w1T = w1.T.astype(jnp.bfloat16); b1c = b1.reshape(-1, 1).astype(jnp.float32)
    w2T = w2.T.astype(jnp.bfloat16); b2c = b2.reshape(-1, 1).astype(jnp.float32)
    w3T = w3.T.astype(jnp.bfloat16); b3c = b3.reshape(-1, 1).astype(jnp.float32)

    const = lambda i: (0, 0)  # weights/biases: same block every step -> stay VMEM-resident
    oT = pl.pallas_call(
        _make_mlp_kernel(activation),
        out_shape=jax.ShapeDtypeStruct((1, b_pad), jnp.float32),
        grid=grid,
        in_specs=[
            pl.BlockSpec((n_in, tile_b), lambda i: (0, i)),  # x tile: the only per-step DMA
            pl.BlockSpec(w1T.shape, const), pl.BlockSpec(b1c.shape, const),
            pl.BlockSpec(w2T.shape, const), pl.BlockSpec(b2c.shape, const),
            pl.BlockSpec(w3T.shape, const), pl.BlockSpec(b3c.shape, const),
        ],
        out_specs=pl.BlockSpec((1, tile_b), lambda i: (0, i)),  # lane-dense output
        compiler_params=pltpu.CompilerParams(
            dimension_semantics=("parallel",)),  # shard batch tiles across v7x's 2 TCs
    )(xT, w1T, b1c, w2T, b2c, w3T, b3c)

    return oT[0, :B].reshape(B, 1)


def init_bnn_params(key, n_inputs, layers=(32, 32), prior_mu=0.0, prior_sigma=0.1):
    """torchbnn-style BayesLinear params: (w_mu, w_log_sigma, b_mu, b_log_sigma) per layer.

    mu ~ U(-1/sqrt(fan_in), 1/sqrt(fan_in)) (PyTorch Linear-style), log_sigma = log(prior_sigma).
    Weights are stored as (in_features, out_features) so y = x @ W + b.
    """
    del prior_mu  # mu is initialized from the uniform init, as in torchbnn
    params = []
    fan_in = n_inputs
    for out_dim in list(layers) + [1]:
        key, kw, kb = jax.random.split(key, 3)
        bound = 1.0 / jnp.sqrt(float(fan_in))
        w_mu = jax.random.uniform(kw, (fan_in, out_dim), jnp.float32, -bound, bound)
        b_mu = jax.random.uniform(kb, (1, out_dim), jnp.float32, -bound, bound)
        w_ls = jnp.full((fan_in, out_dim), jnp.log(prior_sigma), jnp.float32)
        b_ls = jnp.full((1, out_dim), jnp.log(prior_sigma), jnp.float32)
        params.append((w_mu, w_ls, b_mu, b_ls))
        fan_in = out_dim
    return params


def sample_bayes_params(key, bayes_params):
    """One reparameterized posterior draw per layer: W = mu + exp(log_sigma) * eps."""
    eff = []
    for (w_mu, w_ls, b_mu, b_ls) in bayes_params:
        key, kw, kb = jax.random.split(key, 3)
        w = w_mu + jnp.exp(w_ls) * jax.random.normal(kw, w_mu.shape, w_mu.dtype)
        b = b_mu + jnp.exp(b_ls) * jax.random.normal(kb, b_mu.shape, b_mu.dtype)
        eff.append((w, b))
    return eff


def reference_forward(x, eff_params, activation="relu"):
    """Pure-JAX reference with the same bf16-matmul / f32-epilogue precision recipe."""
    h = x
    n = len(eff_params)
    for i, (w, b) in enumerate(eff_params):
        h = jnp.dot(h.astype(jnp.bfloat16), w.astype(jnp.bfloat16),
                    preferred_element_type=jnp.float32) + b
        if i < n - 1:
            h = jnp.maximum(h, 0.0) if activation == "relu" else jnp.tanh(h)
    return jax.nn.sigmoid(h)


if __name__ == "__main__":
    key = jax.random.PRNGKey(0)
    B, n_inputs = 8, 16
    kx, kp, ks = jax.random.split(key, 3)
    x = jax.random.normal(kx, (B, n_inputs), jnp.float32)

    bayes_params = init_bnn_params(kp, n_inputs, layers=(32, 32),
                                   prior_mu=0.0, prior_sigma=0.1)
    eff_params = sample_bayes_params(ks, bayes_params)  # one posterior sample per forward

    out = bnn_forward(x, eff_params, activation="relu")
    out = jax.block_until_ready(out)

    ref = reference_forward(x, eff_params, activation="relu")
    assert out.shape == (B, 1)
    assert jnp.allclose(out, ref, atol=2e-3, rtol=2e-3), "mismatch vs reference"
    print("KERNEL_OK")
</pallas_src>

<mosaic_0001>
module attributes {stable_mosaic.version = 11 : i64} {
  func.func @kernel(%arg0: i32, %arg1: memref<16x128xbf16, #tpu.memory_space<vmem>>, %arg2: memref<32x16xbf16, #tpu.memory_space<vmem>>, %arg3: memref<32x1xf32, #tpu.memory_space<vmem>>, %arg4: memref<32x32xbf16, #tpu.memory_space<vmem>>, %arg5: memref<32x1xf32, #tpu.memory_space<vmem>>, %arg6: memref<1x32xbf16, #tpu.memory_space<vmem>>, %arg7: memref<1x1xf32, #tpu.memory_space<vmem>>, %arg8: memref<1x128xf32, #tpu.memory_space<vmem>>) attributes {dimension_semantics = [#tpu.dimension_semantics<parallel>], iteration_bounds = array<i64: 1>, scalar_prefetch = 0 : i64, scratch_operands = 0 : i64, tpu.core_type = #tpu.core_type<tc>, window_params = [{transform_indices = @transform_0, window_bounds = array<i64: 16, 128>}, {pipeline_mode = #tpu.pipeline_mode<synchronous>, transform_indices = @transform_1, window_bounds = array<i64: 32, 16>}, {pipeline_mode = #tpu.pipeline_mode<synchronous>, transform_indices = @transform_2, window_bounds = array<i64: 32, 1>}, {pipeline_mode = #tpu.pipeline_mode<synchronous>, transform_indices = @transform_3, window_bounds = array<i64: 32, 32>}, {pipeline_mode = #tpu.pipeline_mode<synchronous>, transform_indices = @transform_4, window_bounds = array<i64: 32, 1>}, {pipeline_mode = #tpu.pipeline_mode<synchronous>, transform_indices = @transform_5, window_bounds = array<i64: 1, 32>}, {pipeline_mode = #tpu.pipeline_mode<synchronous>, transform_indices = @transform_6, window_bounds = array<i64: 1, 1>}, {transform_indices = @transform_7, window_bounds = array<i64: 1, 128>}]} {
    %c0 = arith.constant 0 : index
    %c0_0 = arith.constant 0 : index
    %0 = vector.load %arg1[%c0, %c0_0] : memref<16x128xbf16, #tpu.memory_space<vmem>>, vector<16x128xbf16>
    %c0_1 = arith.constant 0 : index
    %c0_2 = arith.constant 0 : index
    %1 = vector.load %arg2[%c0_1, %c0_2] : memref<32x16xbf16, #tpu.memory_space<vmem>>, vector<32x16xbf16>
    %cst = arith.constant dense<0.000000e+00> : vector<32x128xf32>
    %2 = tpu.matmul %1, %0, %cst {dimension_numbers = #tpu.dot_dimension_numbers<[1], [0], [0], [1], [0, 0, 1, 1], [], []>} : vector<32x16xbf16>, vector<16x128xbf16>, vector<32x128xf32> -> vector<32x128xf32>
    %c0_3 = arith.constant 0 : index
    %c0_4 = arith.constant 0 : index
    %3 = vector.load %arg3[%c0_3, %c0_4] : memref<32x1xf32, #tpu.memory_space<vmem>>, vector<32x1xf32>
    %4 = vector.broadcast %3 : vector<32x1xf32> to vector<32x128xf32>
    %5 = arith.addf %2, %4 : vector<32x128xf32>
    %cst_5 = arith.constant 0.000000e+00 : f32
    %6 = vector.broadcast %cst_5 : f32 to vector<32x128xf32>
    %7 = arith.maximumf %5, %6 : vector<32x128xf32>
    %c0_6 = arith.constant 0 : index
    %c0_7 = arith.constant 0 : index
    %8 = vector.load %arg4[%c0_6, %c0_7] : memref<32x32xbf16, #tpu.memory_space<vmem>>, vector<32x32xbf16>
    %9 = arith.truncf %7 : vector<32x128xf32> to vector<32x128xbf16>
    %cst_8 = arith.constant dense<0.000000e+00> : vector<32x128xf32>
    %10 = tpu.matmul %8, %9, %cst_8 {dimension_numbers = #tpu.dot_dimension_numbers<[1], [0], [0], [1], [0, 0, 1, 1], [], []>} : vector<32x32xbf16>, vector<32x128xbf16>, vector<32x128xf32> -> vector<32x128xf32>
    %c0_9 = arith.constant 0 : index
    %c0_10 = arith.constant 0 : index
    %11 = vector.load %arg5[%c0_9, %c0_10] : memref<32x1xf32, #tpu.memory_space<vmem>>, vector<32x1xf32>
    %12 = vector.broadcast %11 : vector<32x1xf32> to vector<32x128xf32>
    %13 = arith.addf %10, %12 : vector<32x128xf32>
    %cst_11 = arith.constant 0.000000e+00 : f32
    %14 = vector.broadcast %cst_11 : f32 to vector<32x128xf32>
    %15 = arith.maximumf %13, %14 : vector<32x128xf32>
    %c0_12 = arith.constant 0 : index
    %c0_13 = arith.constant 0 : index
    %16 = vector.load %arg6[%c0_12, %c0_13] : memref<1x32xbf16, #tpu.memory_space<vmem>>, vector<1x32xbf16>
    %17 = arith.truncf %15 : vector<32x128xf32> to vector<32x128xbf16>
    %cst_14 = arith.constant dense<0.000000e+00> : vector<1x128xf32>
    %18 = tpu.matmul %16, %17, %cst_14 {dimension_numbers = #tpu.dot_dimension_numbers<[1], [0], [0], [1], [0, 0, 1, 1], [], []>} : vector<1x32xbf16>, vector<32x128xbf16>, vector<1x128xf32> -> vector<1x128xf32>
    %c0_15 = arith.constant 0 : index
    %c0_16 = arith.constant 0 : index
    %19 = vector.load %arg7[%c0_15, %c0_16] : memref<1x1xf32, #tpu.memory_space<vmem>>, vector<1x1xf32>
    %20 = vector.broadcast %19 : vector<1x1xf32> to vector<1x128xf32>
    %21 = arith.addf %18, %20 : vector<1x128xf32>
    %22 = arith.negf %21 : vector<1x128xf32>
    %23 = math.exp %22 : vector<1x128xf32>
    %cst_17 = arith.constant 1.000000e+00 : f32
    %24 = vector.broadcast %cst_17 : f32 to vector<1x128xf32>
    %25 = arith.addf %24, %23 : vector<1x128xf32>
    %26 = arith.divf %24, %25 : vector<1x128xf32>
    %c0_18 = arith.constant 0 : index
    %c0_19 = arith.constant 0 : index
    %27 = vector.load %arg8[%c0_18, %c0_19] : memref<1x128xf32, #tpu.memory_space<vmem>>, vector<1x128xf32>
    tpu.vector_store %arg8[%c0_18, %c0_19], %26 {strides = array<i32>} : memref<1x128xf32, #tpu.memory_space<vmem>>, vector<1x128xf32>,
    return
  }
  func.func @transform_0(%arg0: i32) -> (i32, i32) {
    %c0_i32 = arith.constant 0 : i32
    %c0_i32_0 = arith.constant 0 : i32
    return %c0_i32, %arg0 : i32, i32
  }
  func.func @transform_1(%arg0: i32) -> (i32, i32) {
    %c0_i32 = arith.constant 0 : i32
    %c0_i32_0 = arith.constant 0 : i32
    %c0_i32_1 = arith.constant 0 : i32
    return %c0_i32, %c0_i32_0 : i32, i32
  }
  func.func @transform_2(%arg0: i32) -> (i32, i32) {
    %c0_i32 = arith.constant 0 : i32
    %c0_i32_0 = arith.constant 0 : i32
    %c0_i32_1 = arith.constant 0 : i32
    return %c0_i32, %c0_i32_0 : i32, i32
  }
  func.func @transform_3(%arg0: i32) -> (i32, i32) {
    %c0_i32 = arith.constant 0 : i32
    %c0_i32_0 = arith.constant 0 : i32
    %c0_i32_1 = arith.constant 0 : i32
    return %c0_i32, %c0_i32_0 : i32, i32
  }
  func.func @transform_4(%arg0: i32) -> (i32, i32) {
    %c0_i32 = arith.constant 0 : i32
    %c0_i32_0 = arith.constant 0 : i32
    %c0_i32_1 = arith.constant 0 : i32
    return %c0_i32, %c0_i32_0 : i32, i32
  }
  func.func @transform_5(%arg0: i32) -> (i32, i32) {
    %c0_i32 = arith.constant 0 : i32
    %c0_i32_0 = arith.constant 0 : i32
    %c0_i32_1 = arith.constant 0 : i32
    return %c0_i32, %c0_i32_0 : i32, i32
  }
  func.func @transform_6(%arg0: i32) -> (i32, i32) {
    %c0_i32 = arith.constant 0 : i32
    %c0_i32_0 = arith.constant 0 : i32
    %c0_i32_1 = arith.constant 0 : i32
    return %c0_i32, %c0_i32_0 : i32, i32
  }
  func.func @transform_7(%arg0: i32) -> (i32, i32) {
    %c0_i32 = arith.constant 0 : i32
    %c0_i32_0 = arith.constant 0 : i32
    return %c0_i32, %arg0 : i32, i32
  }
}

</mosaic_0001>

<bundles_post_ra>
// kernel: tpu_custom_call.1
= control target key start
LH: loop header
LB: loop body
LE: loop exit
PB: predicated region body
PF: predicated region fallthrough
CT: control target
= control target key end

     0   :  { %s399_s0 = inlined_call_operand.vmem [shape: bf16[16,128], index: 0, kind: input, shape index: {}]   ;;  %s400_s1 = inlined_call_operand.vmem [shape: bf16[32,16], index: 1, kind: input, shape index: {}]   ;;  %s401_s2 = inlined_call_operand.vmem [shape: f32[32,1], index: 2, kind: input, shape index: {}]   ;;  %s402_s3 = inlined_call_operand.vmem [shape: bf16[32,32], index: 3, kind: input, shape index: {}]   ;;  %s403_s4 = inlined_call_operand.vmem [shape: f32[32,1], index: 4, kind: input, shape index: {}]   ;;  %s404_s5 = inlined_call_operand.vmem [shape: bf16[1,32], index: 5, kind: input, shape index: {}]   ;;  %s405_s6 = inlined_call_operand.<no memory space> [shape: f32[1,1], index: 6, kind: input, shape index: {}]   ;;  %s406_s7 = inlined_call_operand.hbm [shape: f32[1,128], index: 7, kind: output, shape index: {}]  }
   0x1   :  { %v12_v0 = vstv %s405_s6 }
   0x2   :  { %13 = vst [vmem:[#allocation2] sm:$0x1] %v12_v0 }
   0x3   :  { %v264_v1 = vld [vmem:[%s399_s0] sm:$0xff]  ;;  %v38_v2 = vld [vmem:[%s401_s2 + $0x10] sm:$0xff]  ;;  %v306_v4 = vmov 0   ;;  %vm76_vm0 = vcmask 130048  }
   0x4   :  { %v265_v3 = vld [vmem:[%s400_s1] sm:$0xff]  ;;  %274 = vset.pattern.permute.xlu1 %v306_v4  ;;  %273 = vset.pattern.permute.xlu0 %v306_v4 }
   0x5   :  { %v36_v5 = vld [vmem:[%s401_s2] sm:$0xff]  ;;  %90 = vmatpush.bf16.msra.mxu0 %v264_v1  ;;  %52 = vperm.xlu0 %273, %v38_v2  }
   0x6   :  { %42 = vperm.xlu1 %274, %v36_v5   ;;  %275 = vset.pattern.permute.xlu2 %v306_v4 }
   0x7   :  { %14 = vsyncpa [#allocation4], 0  ;;  %v39_v6 = vld [vmem:[%s401_s2 + $0x18] sm:$0xff]  ;;  %v37_v7 = vld [vmem:[%s401_s2 + $0x8] sm:$0xff]  ;;  %vm146_vm1 = vcmask 261120   ;;  %s229_s28 = sshll.u32 %s406_s7, 4  ;;  %s230_s28 = int_to_ptr.hbm [resolvable:$true] %s229_s28 }
   0x8   :  { %250 = vmatmul.msk.bf16.vlgmr.msra.gmra.mxu0 %vm76_vm0, %v265_v3  ;;  %v112_v8 = vld [vmem:[%s403_s4] sm:$0xff]  ;;  %v113_v9 = vld [vmem:[%s403_s4 + $0x8] sm:$0xff]  ;;  %v114_v12 = vld [vmem:[%s403_s4 + $0x10] sm:$0xff] }
   0x9   :  { %v266_v10 = vld [vmem:[%s400_s1 + $0x8] sm:$0xff]  ;;  %128 = vperm.xlu2 %275, %v114_v12   ;;  %v115_v15 = vld [vmem:[%s403_s4 + $0x18] sm:$0xff]  ;;  %v179_v18 = vld [vmem:[#allocation2] sm:$0x1] }
   0xa   :  { %v267_v32 = vld [vmem:[%s402_s3] sm:$0xff]  ;;  %v268_v33 = vld [vmem:[%s402_s3 + $0x8] sm:$0xff] }
   0xb   :  { %v176_v52 = vld [vmem:[%s404_s5] sm:$0x1]  ;;  %s307_s5 = smov [#allocation3]  }
   0xc   :  { %s227_s25 = sshll.u32 %s307_s5, 4  ;;  %s228_s25 = int_to_ptr.vmem [resolvable:$true] %s227_s25 }
   0xd   :  { %57 = vperm.xlu0 %273, %v39_v6  }
   0xe   :  { %47 = vperm.xlu1 %274, %v37_v7  }
  0x11   :  { %133 = vperm.xlu2 %275, %v115_v15  }
  0x15   :  { %118 = vperm.xlu0 %273, %v112_v8  }
  0x16   :  { %123 = vperm.xlu1 %274, %v113_v9  }
  0x18   :  { %251 = vmatmul.msk.bf16.gmra.mxu0 %vm76_vm0, %v266_v10 }
  0x19   :  { %182 = vperm.xlu2 %275, %v179_v18  }
  0x63   :  { %v129_v35 = vpop.permute.xlu2 %128 }
  0x6b   :  { %v134_v40 = vpop.permute.xlu2 %133 }
  0x73   :  { %v183_v53 = vpop.permute.xlu2 %182 }
  0x74   :  { %v185_v54 = vperm.slane %v183_v53, 0 }
  0x77   :  { %v53_v16 = vpop.permute.xlu0 %52 }
  0x78   :  { %v43_v14 = vpop.permute.xlu1 %42 }
  0x7f   :  { %v58_v21 = vpop.permute.xlu0 %57 }
  0x80   :  { %v48_v19 = vpop.permute.xlu1 %47 }
  0x85   :  { %v92_v11 = vpop.f32.mrf.mxu0 }
  0x86   :  { %v93_v25 = vadd.f32 %v92_v11, %v43_v14 }
  0x87   :  { %v119_v44 = vpop.permute.xlu0 %118 }
  0x88   :  { %v102_v30 = vmax.f32 %v93_v25, 0.0  ;;  %v124_v38 = vpop.permute.xlu1 %123 }
  0x8d   :  { %v94_v13 = vpop.f32.mrf.mxu0 }
  0x8e   :  { %v95_v23 = vadd.f32 %v94_v13, %v48_v19 }
  0x90   :  { %v103_v28 = vmax.f32 %v95_v23, 0.0 }
  0x92   :  { %v110_v31 = vpack.c.bf16 %v103_v28, %v102_v30 }
  0x95   :  { %v97_v17 = vpop.f32.mrf.mxu0 }
  0x96   :  { %v98_v20 = vadd.f32 %v97_v17, %v53_v16 }
  0x98   :  { %v104_v26 = vmax.f32 %v98_v20, 0.0 }
  0x9d   :  { %v99_v22 = vpop.f32.mrf.mxu0 }
  0x9e   :  { %v100_v24 = vadd.f32 %v99_v22, %v58_v21 }
  0xa0   :  { %v105_v27 = vmax.f32 %v100_v24, 0.0 }
  0xa2   :  { %v111_v29 = vpack.c.bf16 %v105_v27, %v104_v26 }
  0xa4   :  { %159 = vmatpush.bf16.msra.mxu1 %v111_v29  ;;  %269 = vmatpush.bf16.msra.mxu3 %v111_v29 }
  0xa8   :  { %160 = vmatpush.bf16.msra.mxu1 %v110_v31  ;;  %270 = vmatpush.bf16.msra.mxu3 %v110_v31 }
  0xab   :  { %260 = vmatmul.msk.bf16.vlgmr.msra.gmra.mxu1 %vm146_vm1, %v267_v32  ;;  %261 = vmatmul.msk.bf16.vlgmr.msra.gmra.mxu3 %vm146_vm1, %v268_v33 }
 0x128   :  { %v162_v34 = vpop.f32.mrf.mxu1 }
 0x129   :  { %v163_v45 = vadd.f32 %v162_v34, %v119_v44 }
 0x12b   :  { %v172_v50 = vmax.f32 %v163_v45, 0.0 }
 0x12e   :  { %v167_v36 = vpop.f32.mrf.mxu3 }
 0x12f   :  { %v168_v39 = vadd.f32 %v167_v36, %v129_v35 }
 0x130   :  { %v164_v37 = vpop.f32.mrf.mxu1 }
 0x131   :  { %v165_v42 = vadd.f32 %v164_v37, %v124_v38  ;;  %v174_v46 = vmax.f32 %v168_v39, 0.0 }
 0x133   :  { %v173_v48 = vmax.f32 %v165_v42, 0.0 }
 0x135   :  { %v177_v51 = vpack.c.bf16 %v173_v48, %v172_v50 }
 0x136   :  { %v169_v41 = vpop.f32.mrf.mxu3 }
 0x137   :  { %v170_v43 = vadd.f32 %v169_v41, %v134_v40 }
 0x139   :  { %v175_v47 = vmax.f32 %v170_v43, 0.0 }
 0x13b   :  { %v178_v49 = vpack.c.bf16 %v175_v47, %v174_v46 }
 0x13d   :  { %195 = vmatpush.bf16.msra.mxu2 %v178_v49 }
 0x141   :  { %196 = vmatpush.bf16.msra.mxu2 %v177_v51 }
 0x144   :  { %262 = vmatmul.msk.bf16.vlgmr.msra.gmra.mxu2 %vm146_vm1, %v176_v52 }
 0x1c7   :  { %v198_v55 = vpop.f32.mrf.mxu2 }
 0x1c8   :  { %v199_v56 = vadd.f32 %v198_v55, %v185_v54 }
 0x1ca   :  { %v263_v57 = vmul.f32 -1.442695, %v199_v56 }
 0x1cc   :  { %276 = vpow2.f32 %v263_v57 }
 0x1cf   :  { %v200_v58 = vpop.f32.mrf.mxu2 }
 0x1d2   :  { %v277_v59 = vpop.eup %276 }
 0x1d3   :  { %v205_v60 = vadd.f32 1.0, %v277_v59 }
 0x1d5   :  { %278 = vrcp.f32 %v205_v60  ;;  %v217_v0 = vand.u32 2147483648, %v205_v60  ;;  %v215_v2 = vand.u32 2147483647, %v205_v60  ;;  %vm211_vm3 = vweird.f32 %v205_v60 }
 0x1d7   :  { %v218_v4 = vor.u32 1.1754944e-38, %v217_v0  ;;  %vm216_vm5 = vcmp.eq.f32.partialorder %v215_v2, 8.507059e+37 }
 0x1db   :  { %v279_v61 = vpop.eup %278 }
 0x1dc   :  { %v207_v62 = vmul.f32 %v279_v61, %v205_v60  ;;  %vm212_vm2 = vweird.f32 %v279_v61 }
 0x1dd   :  { %vm213_vm4 = vmor %vm211_vm3, %vm212_vm2 }
 0x1de   :  { %v208_v63 = vsub.f32 1.0, %v207_v62 }
 0x1e0   :  { %v209_v1 = vmul.f32 %v279_v61, %v208_v63 }
 0x1e2   :  { %v210_v3 = vadd.f32 %v279_v61, %v209_v1 }
 0x1e4   :  { %v214_v5 = vsel %vm213_vm4, %v279_v61, %v210_v3 }
 0x1e5   :  { %v219_v6 = vsel %vm216_vm5, %v218_v4, %v214_v5 }
 0x1e6   :  { %221 = vst [vmem:[#allocation3] sm:$0x1] %v219_v6 }
 0x1e7   :  { %232 = dma.vmem_to_hbm [thread:$0]  %s228_s25, 16, %s230_s28, [#allocation4]  }
 0x1e8   :  { %304 = dma.done.wait [#allocation4], 16  }
 0x1e9   :  { %305 = vsyncadd [#allocation4], 4294967280 }
 0x1ea   :  { %237 = vsyncpa [#allocation4], 1 }

</bundles_post_ra>
